<compile_context>
chip_gen: v7x
topology: tpu7x:2x2x1
jax: 0.10.0
libtpu: 0.0.40
codegen_flags: <defaults>
</compile_context>

<pallas_src>
import functools

import jax
import jax.numpy as jnp
from jax import lax
from jax.experimental import pallas as pl
from jax.experimental.pallas import tpu as pltpu


def _shift_flat(a, s):
    """a: (C, P).  Returns b with b[:, p] = a[:, p + s] if 0 <= p + s < P else 0."""
    if s == 0:
        return a
    c, p = a.shape
    if s > 0:
        return jnp.concatenate([a[:, s:], jnp.zeros((c, s), a.dtype)], axis=1)
    return jnp.concatenate([jnp.zeros((c, -s), a.dtype), a[:, : p + s]], axis=1)


def _channel_att_kernel(x_ref, masks_ref, w3s_ref, b3_ref, w1f_ref, b1f_ref,
                        feat_ref, att_ref, *, H, W):
    # x_ref    : (1, C_in, H*W)    one batch element, channels on sublanes, HW on lanes
    # masks_ref: (2, H*W)          row 0: zero at w==W-1 (for dx=-1), row 1: zero at w==0 (dx=+1)
    # w3s_ref  : (C_out, 9*C_in)   3x3 conv weights, BN1 scale folded in, tap-major (dy, dx)
    # b3_ref   : (C_out, 1)        folded BN1 shift
    # w1f_ref  : (C_out, C_out)    1x1 conv weights with BN2 scale folded in
    # b1f_ref  : (C_out, 1)        folded BN2 shift
    # feat_ref : (1, C_out, H*W)   output feature map (NC(HW), i.e. NCHW-native)
    # att_ref  : (1, C_out, 1)     channel attention
    hw = H * W
    x = x_ref[0]                                   # (C_in, HW)

    # Column-wrap masks: zeroing these input columns makes the flat shifts below
    # implement exact zero-padding=1 conv semantics (row overflow is handled by
    # the zero fill inside _shift_flat).
    m_neg = masks_ref[0:1, :]                      # used for dx = -1
    m_pos = masks_ref[1:2, :]                      # used for dx = +1
    x_by_dx = {-1: x * m_neg, 0: x, 1: x * m_pos}

    # Stack the 9 shifted views along the (sublane) channel axis -> one fat matmul.
    pieces = []
    for dy in (-1, 0, 1):
        for dx in (-1, 0, 1):
            pieces.append(_shift_flat(x_by_dx[dx], dy * W + dx))
    xstack = jnp.concatenate(pieces, axis=0)       # (9*C_in, HW)

    acc = jnp.dot(w3s_ref[...], xstack, preferred_element_type=jnp.float32)   # (C_out, HW)
    feat = jnp.maximum(acc + b3_ref[...], 0.0)     # folded BN1 + ReLU
    feat_ref[0] = feat.astype(feat_ref.dtype)      # lane-dense store (HW lanes)

    # Channel attention: spatial mean, 1x1 conv (no bias), folded BN2, no activation.
    mean = jnp.sum(feat, axis=1, keepdims=True) * (1.0 / hw)                   # (C_out, 1)
    att = jnp.dot(w1f_ref[...], mean, preferred_element_type=jnp.float32) + b1f_ref[...]
    att_ref[0] = att.astype(att_ref.dtype)


def channel_att_pallas(x_nchw, params, eps=1e-5):
    """x_nchw: (N, C_in, H, W) f32.  Returns (feat (N,C_out,H,W), atten (N,C_out,1,1))."""
    w3 = params["w3"]                              # (C_out, C_in, 3, 3)  torch OIHW
    w1 = params["w1"]                              # (C_out, C_out, 1, 1)
    g1, b1, m1, v1 = params["bn1_gamma"], params["bn1_beta"], params["bn1_mean"], params["bn1_var"]
    g2, b2, m2, v2 = params["bn2_gamma"], params["bn2_beta"], params["bn2_mean"], params["bn2_var"]

    N, C_in, H, W = x_nchw.shape
    C_out = w3.shape[0]
    HW = H * W

    # --- fold BatchNorm (eval mode) into the conv weights, in f32 ---
    scale1 = g1 / jnp.sqrt(v1 + eps)
    shift1 = b1 - m1 * scale1
    scale2 = g2 / jnp.sqrt(v2 + eps)
    shift2 = b2 - m2 * scale2

    # (C_out, C_in, 3, 3) -> (C_out, kh, kw, C_in) -> (C_out, 9*C_in), tap-major (dy, dx).
    w3s = scale1[:, None] * jnp.transpose(w3, (0, 2, 3, 1)).reshape(C_out, 9 * C_in)
    b3 = shift1.reshape(C_out, 1)
    w1f = scale2[:, None] * w1[:, :, 0, 0]         # (C_out, C_out)
    b1f = shift2.reshape(C_out, 1)

    # NCHW -> (N, C_in, H*W): pure reshape, no transpose / pad / extra HBM pass.
    x_flat = x_nchw.reshape(N, C_in, HW)

    # Column-wrap masks for the in-kernel flat shifts.
    w_idx = jnp.arange(HW, dtype=jnp.int32) % W
    masks = jnp.stack([(w_idx != (W - 1)).astype(jnp.float32),
                       (w_idx != 0).astype(jnp.float32)], axis=0)              # (2, HW)

    # Explicit VMEM budget: 2x (double-buffered) tiles + weights + headroom,
    # clamped to a range that is safe on v5e/v6e/v7x.
    tile_bytes = 4 * (C_in * HW + C_out * HW + C_out + 2 * HW
                      + C_out * 9 * C_in + C_out * C_out + 2 * C_out)
    vmem_limit = int(min(max(4 * tile_bytes + (8 << 20), 16 << 20), 32 << 20))

    kernel = functools.partial(_channel_att_kernel, H=H, W=W)
    feat_flat, att_flat = pl.pallas_call(
        kernel,
        out_shape=(jax.ShapeDtypeStruct((N, C_out, HW), jnp.float32),
                   jax.ShapeDtypeStruct((N, C_out, 1), jnp.float32)),
        grid_spec=pltpu.PrefetchScalarGridSpec(
            num_scalar_prefetch=0,
            grid=(N,),
            in_specs=[
                pl.BlockSpec((1, C_in, HW), lambda n: (n, 0, 0)),
                pl.BlockSpec((2, HW), lambda n: (0, 0)),
                pl.BlockSpec((C_out, 9 * C_in), lambda n: (0, 0)),
                pl.BlockSpec((C_out, 1), lambda n: (0, 0)),
                pl.BlockSpec((C_out, C_out), lambda n: (0, 0)),
                pl.BlockSpec((C_out, 1), lambda n: (0, 0)),
            ],
            out_specs=(
                pl.BlockSpec((1, C_out, HW), lambda n: (n, 0, 0)),
                pl.BlockSpec((1, C_out, 1), lambda n: (n, 0, 0)),
            ),
        ),
        compiler_params=pltpu.CompilerParams(
            dimension_semantics=("parallel",),
            vmem_limit_bytes=vmem_limit,
        ),
    )(x_flat, masks, w3s, b3, w1f, b1f)

    feat = feat_flat.reshape(N, C_out, H, W)       # free reshapes (row-major compatible)
    atten = att_flat.reshape(N, C_out, 1, 1)
    return feat, atten


def _reference(x_nchw, params, eps=1e-5):
    """Plain-JAX reference (lax conv) mirroring the PyTorch module in eval mode."""
    w3, w1 = params["w3"], params["w1"]
    g1, b1, m1, v1 = params["bn1_gamma"], params["bn1_beta"], params["bn1_mean"], params["bn1_var"]
    g2, b2, m2, v2 = params["bn2_gamma"], params["bn2_beta"], params["bn2_mean"], params["bn2_var"]

    scale1 = g1 / jnp.sqrt(v1 + eps)
    shift1 = b1 - m1 * scale1
    scale2 = g2 / jnp.sqrt(v2 + eps)
    shift2 = b2 - m2 * scale2

    y = lax.conv_general_dilated(x_nchw, w3, (1, 1), ((1, 1), (1, 1)),
                                 dimension_numbers=("NCHW", "OIHW", "NCHW"))
    feat = jnp.maximum(y * scale1[None, :, None, None] + shift1[None, :, None, None], 0.0)

    atten = jnp.mean(feat, axis=(2, 3), keepdims=True)
    z = lax.conv_general_dilated(atten, w1, (1, 1), ((0, 0), (0, 0)),
                                 dimension_numbers=("NCHW", "OIHW", "NCHW"))
    atten = z * scale2[None, :, None, None] + shift2[None, :, None, None]
    return feat, atten


def make_params(key, in_channels, out_channels):
    ks = jax.random.split(key, 10)
    w3 = 0.1 * jax.random.normal(ks[0], (out_channels, in_channels, 3, 3), jnp.float32)
    w1 = 0.1 * jax.random.normal(ks[1], (out_channels, out_channels, 1, 1), jnp.float32)
    return {
        "w3": w3,
        "bn1_gamma": 1.0 + 0.1 * jax.random.normal(ks[2], (out_channels,), jnp.float32),
        "bn1_beta": 0.1 * jax.random.normal(ks[3], (out_channels,), jnp.float32),
        "bn1_mean": 0.1 * jax.random.normal(ks[4], (out_channels,), jnp.float32),
        "bn1_var": jnp.abs(1.0 + 0.1 * jax.random.normal(ks[5], (out_channels,), jnp.float32)),
        "w1": w1,
        "bn2_gamma": 1.0 + 0.1 * jax.random.normal(ks[6], (out_channels,), jnp.float32),
        "bn2_beta": 0.1 * jax.random.normal(ks[7], (out_channels,), jnp.float32),
        "bn2_mean": 0.1 * jax.random.normal(ks[8], (out_channels,), jnp.float32),
        "bn2_var": jnp.abs(1.0 + 0.1 * jax.random.normal(ks[9], (out_channels,), jnp.float32)),
    }


if __name__ == "__main__":
    N, C_IN, C_OUT, H, W = 2, 4, 8, 16, 16

    key = jax.random.PRNGKey(0)
    k_x, k_p = jax.random.split(key)
    x = jax.random.normal(k_x, (N, C_IN, H, W), jnp.float32)
    params = make_params(k_p, C_IN, C_OUT)

    feat, atten = channel_att_pallas(x, params)
    feat, atten = jax.block_until_ready((feat, atten))

    ref_feat, ref_att = jax.block_until_ready(_reference(x, params))

    assert feat.shape == (N, C_OUT, H, W)
    assert atten.shape == (N, C_OUT, 1, 1)
    assert jnp.allclose(feat, ref_feat, atol=1e-4, rtol=1e-4), "feat mismatch vs. reference"
    assert jnp.allclose(atten, ref_att, atol=1e-4, rtol=1e-4), "atten mismatch vs. reference"

    print("KERNEL_OK")
</pallas_src>

<mosaic_0001>
module attributes {stable_mosaic.version = 11 : i64} {
  func.func @_channel_att_kernel(%arg0: i32, %arg1: memref<1x4x256xf32, #tpu.memory_space<vmem>>, %arg2: memref<2x256xf32, #tpu.memory_space<vmem>>, %arg3: memref<8x36xf32, #tpu.memory_space<vmem>>, %arg4: memref<8x1xf32, #tpu.memory_space<vmem>>, %arg5: memref<8x8xf32, #tpu.memory_space<vmem>>, %arg6: memref<8x1xf32, #tpu.memory_space<vmem>>, %arg7: memref<1x8x256xf32, #tpu.memory_space<vmem>>, %arg8: memref<1x8x1xf32, #tpu.memory_space<vmem>>) attributes {dimension_semantics = [#tpu.dimension_semantics<parallel>], iteration_bounds = array<i64: 2>, scalar_prefetch = 0 : i64, scratch_operands = 0 : i64, tpu.core_type = #tpu.core_type<tc>, window_params = [{transform_indices = @transform_0, window_bounds = array<i64: 1, 4, 256>}, {pipeline_mode = #tpu.pipeline_mode<synchronous>, transform_indices = @transform_1, window_bounds = array<i64: 2, 256>}, {pipeline_mode = #tpu.pipeline_mode<synchronous>, transform_indices = @transform_2, window_bounds = array<i64: 8, 36>}, {pipeline_mode = #tpu.pipeline_mode<synchronous>, transform_indices = @transform_3, window_bounds = array<i64: 8, 1>}, {pipeline_mode = #tpu.pipeline_mode<synchronous>, transform_indices = @transform_4, window_bounds = array<i64: 8, 8>}, {pipeline_mode = #tpu.pipeline_mode<synchronous>, transform_indices = @transform_5, window_bounds = array<i64: 8, 1>}, {transform_indices = @transform_6, window_bounds = array<i64: 1, 8, 256>}, {transform_indices = @transform_7, window_bounds = array<i64: 1, 8, 1>}]} {
    %c0 = arith.constant 0 : index
    %c0_0 = arith.constant 0 : index
    %c0_1 = arith.constant 0 : index
    %0 = vector.load %arg1[%c0, %c0_0, %c0_1] : memref<1x4x256xf32, #tpu.memory_space<vmem>>, vector<1x4x256xf32>
    %1 = vector.shape_cast %0 : vector<1x4x256xf32> to vector<4x256xf32>
    %c0_2 = arith.constant 0 : index
    %c0_3 = arith.constant 0 : index
    %2 = vector.load %arg2[%c0_2, %c0_3] : memref<2x256xf32, #tpu.memory_space<vmem>>, vector<1x256xf32>
    %c1 = arith.constant 1 : index
    %c0_4 = arith.constant 0 : index
    %3 = vector.load %arg2[%c1, %c0_4] : memref<2x256xf32, #tpu.memory_space<vmem>>, vector<1x256xf32>
    %4 = vector.broadcast %2 : vector<1x256xf32> to vector<4x256xf32>
    %5 = arith.mulf %1, %4 : vector<4x256xf32>
    %6 = vector.broadcast %3 : vector<1x256xf32> to vector<4x256xf32>
    %7 = arith.mulf %1, %6 : vector<4x256xf32>
    %cst = arith.constant 0.000000e+00 : f32
    %8 = vector.broadcast %cst : f32 to vector<4x17xf32>
    %9 = vector.extract_strided_slice %5 {offsets = [0, 0], sizes = [4, 239], strides = [1, 1]} : vector<4x256xf32> to vector<4x239xf32>
    %10 = tpu.concatenate %8, %9 in 1 : vector<4x17xf32>, vector<4x239xf32> -> vector<4x256xf32>
    %cst_5 = arith.constant 0.000000e+00 : f32
    %11 = vector.broadcast %cst_5 : f32 to vector<4x16xf32>
    %12 = vector.extract_strided_slice %1 {offsets = [0, 0], sizes = [4, 240], strides = [1, 1]} : vector<4x256xf32> to vector<4x240xf32>
    %13 = tpu.concatenate %11, %12 in 1 : vector<4x16xf32>, vector<4x240xf32> -> vector<4x256xf32>
    %cst_6 = arith.constant 0.000000e+00 : f32
    %14 = vector.broadcast %cst_6 : f32 to vector<4x15xf32>
    %15 = vector.extract_strided_slice %7 {offsets = [0, 0], sizes = [4, 241], strides = [1, 1]} : vector<4x256xf32> to vector<4x241xf32>
    %16 = tpu.concatenate %14, %15 in 1 : vector<4x15xf32>, vector<4x241xf32> -> vector<4x256xf32>
    %cst_7 = arith.constant 0.000000e+00 : f32
    %17 = vector.broadcast %cst_7 : f32 to vector<4x1xf32>
    %18 = vector.extract_strided_slice %5 {offsets = [0, 0], sizes = [4, 255], strides = [1, 1]} : vector<4x256xf32> to vector<4x255xf32>
    %19 = tpu.concatenate %17, %18 in 1 : vector<4x1xf32>, vector<4x255xf32> -> vector<4x256xf32>
    %20 = vector.extract_strided_slice %7 {offsets = [0, 1], sizes = [4, 255], strides = [1, 1]} : vector<4x256xf32> to vector<4x255xf32>
    %cst_8 = arith.constant 0.000000e+00 : f32
    %21 = vector.broadcast %cst_8 : f32 to vector<4x1xf32>
    %22 = tpu.concatenate %20, %21 in 1 : vector<4x255xf32>, vector<4x1xf32> -> vector<4x256xf32>
    %23 = vector.extract_strided_slice %5 {offsets = [0, 15], sizes = [4, 241], strides = [1, 1]} : vector<4x256xf32> to vector<4x241xf32>
    %cst_9 = arith.constant 0.000000e+00 : f32
    %24 = vector.broadcast %cst_9 : f32 to vector<4x15xf32>
    %25 = tpu.concatenate %23, %24 in 1 : vector<4x241xf32>, vector<4x15xf32> -> vector<4x256xf32>
    %26 = vector.extract_strided_slice %1 {offsets = [0, 16], sizes = [4, 240], strides = [1, 1]} : vector<4x256xf32> to vector<4x240xf32>
    %cst_10 = arith.constant 0.000000e+00 : f32
    %27 = vector.broadcast %cst_10 : f32 to vector<4x16xf32>
    %28 = tpu.concatenate %26, %27 in 1 : vector<4x240xf32>, vector<4x16xf32> -> vector<4x256xf32>
    %29 = vector.extract_strided_slice %7 {offsets = [0, 17], sizes = [4, 239], strides = [1, 1]} : vector<4x256xf32> to vector<4x239xf32>
    %cst_11 = arith.constant 0.000000e+00 : f32
    %30 = vector.broadcast %cst_11 : f32 to vector<4x17xf32>
    %31 = tpu.concatenate %29, %30 in 1 : vector<4x239xf32>, vector<4x17xf32> -> vector<4x256xf32>
    %32 = tpu.concatenate %10, %13, %16, %19, %1, %22, %25, %28, %31 in 0 : vector<4x256xf32>, vector<4x256xf32>, vector<4x256xf32>, vector<4x256xf32>, vector<4x256xf32>, vector<4x256xf32>, vector<4x256xf32>, vector<4x256xf32>, vector<4x256xf32> -> vector<36x256xf32>
    %c0_12 = arith.constant 0 : index
    %c0_13 = arith.constant 0 : index
    %33 = vector.load %arg3[%c0_12, %c0_13] : memref<8x36xf32, #tpu.memory_space<vmem>>, vector<8x36xf32>
    %cst_14 = arith.constant dense<0.000000e+00> : vector<8x256xf32>
    %34 = tpu.matmul %33, %32, %cst_14 {dimension_numbers = #tpu.dot_dimension_numbers<[1], [0], [0], [1], [0, 0, 1, 1], [], []>} : vector<8x36xf32>, vector<36x256xf32>, vector<8x256xf32> -> vector<8x256xf32>
    %c0_15 = arith.constant 0 : index
    %c0_16 = arith.constant 0 : index
    %35 = vector.load %arg4[%c0_15, %c0_16] : memref<8x1xf32, #tpu.memory_space<vmem>>, vector<8x1xf32>
    %36 = vector.broadcast %35 : vector<8x1xf32> to vector<8x256xf32>
    %37 = arith.addf %34, %36 : vector<8x256xf32>
    %cst_17 = arith.constant 0.000000e+00 : f32
    %38 = vector.broadcast %cst_17 : f32 to vector<8x256xf32>
    %39 = arith.maximumf %37, %38 : vector<8x256xf32>
    %c0_18 = arith.constant 0 : index
    %c0_19 = arith.constant 0 : index
    %c0_20 = arith.constant 0 : index
    %40 = vector.load %arg7[%c0_18, %c0_19, %c0_20] : memref<1x8x256xf32, #tpu.memory_space<vmem>>, vector<1x8x256xf32>
    %41 = vector.shape_cast %40 : vector<1x8x256xf32> to vector<8x256xf32>
    %42 = vector.shape_cast %39 : vector<8x256xf32> to vector<1x8x256xf32>
    tpu.vector_store %arg7[%c0_18, %c0_19, %c0_20], %42 {strides = array<i32>} : memref<1x8x256xf32, #tpu.memory_space<vmem>>, vector<1x8x256xf32>,
    %cst_21 = arith.constant dense<0.000000e+00> : vector<8xf32>
    %43 = vector.multi_reduction <add>, %39, %cst_21 [1] : vector<8x256xf32> to vector<8xf32>
    %44 = vector.shape_cast %43 : vector<8xf32> to vector<8x1xf32>
    %cst_22 = arith.constant 3.906250e-03 : f32
    %45 = vector.broadcast %cst_22 : f32 to vector<8x1xf32>
    %46 = arith.mulf %44, %45 : vector<8x1xf32>
    %c0_23 = arith.constant 0 : index
    %c0_24 = arith.constant 0 : index
    %47 = vector.load %arg5[%c0_23, %c0_24] : memref<8x8xf32, #tpu.memory_space<vmem>>, vector<8x8xf32>
    %cst_25 = arith.constant dense<0.000000e+00> : vector<8x1xf32>
    %48 = tpu.matmul %47, %46, %cst_25 {dimension_numbers = #tpu.dot_dimension_numbers<[1], [0], [0], [1], [0, 0, 1, 1], [], []>} : vector<8x8xf32>, vector<8x1xf32>, vector<8x1xf32> -> vector<8x1xf32>
    %c0_26 = arith.constant 0 : index
    %c0_27 = arith.constant 0 : index
    %49 = vector.load %arg6[%c0_26, %c0_27] : memref<8x1xf32, #tpu.memory_space<vmem>>, vector<8x1xf32>
    %50 = arith.addf %48, %49 : vector<8x1xf32>
    %c0_28 = arith.constant 0 : index
    %c0_29 = arith.constant 0 : index
    %c0_30 = arith.constant 0 : index
    %51 = vector.load %arg8[%c0_28, %c0_29, %c0_30] : memref<1x8x1xf32, #tpu.memory_space<vmem>>, vector<1x8x1xf32>
    %52 = vector.shape_cast %51 : vector<1x8x1xf32> to vector<8x1xf32>
    %53 = vector.shape_cast %50 : vector<8x1xf32> to vector<1x8x1xf32>
    tpu.vector_store %arg8[%c0_28, %c0_29, %c0_30], %53 {strides = array<i32>} : memref<1x8x1xf32, #tpu.memory_space<vmem>>, vector<1x8x1xf32>,
    return
  }
  func.func @transform_0(%arg0: i32) -> (i32, i32, i32) {
    %c0_i32 = arith.constant 0 : i32
    %c0_i32_0 = arith.constant 0 : i32
    %c0_i32_1 = arith.constant 0 : i32
    return %arg0, %c0_i32, %c0_i32_0 : i32, i32, i32
  }
  func.func @transform_1(%arg0: i32) -> (i32, i32) {
    %c0_i32 = arith.constant 0 : i32
    %c0_i32_0 = arith.constant 0 : i32
    %c0_i32_1 = arith.constant 0 : i32
    return %c0_i32, %c0_i32_0 : i32, i32
  }
  func.func @transform_2(%arg0: i32) -> (i32, i32) {
    %c0_i32 = arith.constant 0 : i32
    %c0_i32_0 = arith.constant 0 : i32
    %c0_i32_1 = arith.constant 0 : i32
    return %c0_i32, %c0_i32_0 : i32, i32
  }
  func.func @transform_3(%arg0: i32) -> (i32, i32) {
    %c0_i32 = arith.constant 0 : i32
    %c0_i32_0 = arith.constant 0 : i32
    %c0_i32_1 = arith.constant 0 : i32
    return %c0_i32, %c0_i32_0 : i32, i32
  }
  func.func @transform_4(%arg0: i32) -> (i32, i32) {
    %c0_i32 = arith.constant 0 : i32
    %c0_i32_0 = arith.constant 0 : i32
    %c0_i32_1 = arith.constant 0 : i32
    return %c0_i32, %c0_i32_0 : i32, i32
  }
  func.func @transform_5(%arg0: i32) -> (i32, i32) {
    %c0_i32 = arith.constant 0 : i32
    %c0_i32_0 = arith.constant 0 : i32
    %c0_i32_1 = arith.constant 0 : i32
    return %c0_i32, %c0_i32_0 : i32, i32
  }
  func.func @transform_6(%arg0: i32) -> (i32, i32, i32) {
    %c0_i32 = arith.constant 0 : i32
    %c0_i32_0 = arith.constant 0 : i32
    %c0_i32_1 = arith.constant 0 : i32
    return %arg0, %c0_i32, %c0_i32_0 : i32, i32, i32
  }
  func.func @transform_7(%arg0: i32) -> (i32, i32, i32) {
    %c0_i32 = arith.constant 0 : i32
    %c0_i32_0 = arith.constant 0 : i32
    %c0_i32_1 = arith.constant 0 : i32
    return %arg0, %c0_i32, %c0_i32_0 : i32, i32, i32
  }
}

</mosaic_0001>

<bundles_post_ra>
// kernel: tpu_custom_call.1
= control target key start
LH: loop header
LB: loop body
LE: loop exit
PB: predicated region body
PF: predicated region fallthrough
CT: control target
= control target key end

     0   :  { %13 = vsyncpa [#allocation3], 0  ;;  %s1196_s0 = inlined_call_operand.vmem [shape: f32[2,4,256], index: 0, kind: input, shape index: {}]   ;;  %s1197_s1 = inlined_call_operand.hbm [shape: f32[2,256], index: 1, kind: input, shape index: {}]   ;;  %s1198_s2 = inlined_call_operand.vmem [shape: f32[8,36], index: 2, kind: input, shape index: {}]   ;;  %s1199_s3 = inlined_call_operand.vmem [shape: f32[8,1], index: 3, kind: input, shape index: {}]   ;;  %s1200_s4 = inlined_call_operand.vmem [shape: f32[8,8], index: 4, kind: input, shape index: {}]   ;;  %s1201_s5 = inlined_call_operand.vmem [shape: f32[8,1], index: 5, kind: input, shape index: {}]   ;;  %s1202_s6 = inlined_call_operand.hbm [shape: f32[2,8,256], index: 6, kind: output, shape index: {0}]   ;;  %s1203_s7 = inlined_call_operand.vmem [shape: f32[2,8,1], index: 7, kind: output, shape index: {1}]  }
   0x1   :  { %14 = vsyncpa [#allocation4], 0 }
   0x2   :  { %16 = vsyncpa [#allocation4 + $0x1], 0  ;;  %s1005_s24 = smov 0   ;;  %s1007_s25 = smov 0  }
   0x3   :  { %s1009_s26 = smov 0   ;;  %s1011_s27 = smov 0  }
   0x4 LB: > { %s1026_s28 = sadd.s32 4294967295, %s950_s27   ;;  %s721_s29 = sadd.s32 4294967294, %s950_s27   ;;  %s950_s27 = sphi %s1011_s27, %s1219_s27   ;;  %s946_s26 = sphi %s1009_s26, %s1218_s26   ;;  %s942_s25 = sphi %s1007_s25, %s1217_s25   ;;  %s938_s24 = sphi %s1005_s24, %s1216_s24  }
   0x5   : > { %s1030_s30 = sadd.s32 1, %s950_s27   ;;  %s160_s8 = sadd.s32 1, %s946_s26 }
   0x6   : > { %s157_s9 = ssub.s32 %s950_s27, %s1030_s30  ;;  %p170_p0 = scmp.ne.s32.totalorder %s946_s26, %s942_s25 }
   0x7   : > { %p158_p1 = scmp.eq.s32.totalorder %s157_s9, 0  ;;  %p171_p2 = scmp.eq.s32.totalorder %s1026_s28, 1 }
   0x8   : > { %p176_p3 = scmp.ne.s32.totalorder %s942_s25, %s938_s24  ;;  %p177_p4 = scmp.eq.s32.totalorder %s721_s29, 1 }
   0x9   : > { %s1041_s10 = scalar_select %p158_p1, %s946_s26, %s160_s8  }
   0xa   : > { %p1043_p5 = por %p171_p2, %p170_p0  ;;  %p1047_p6 = por %p177_p4, %p176_p3 }
   0xb   : > { %p722_p7 = scmp.ge.s32.totalorder %s950_s27, 1  ;;  %p210_p8 = scmp.lt.s32.totalorder %s950_s27, 3 }
   0xc   : > { %s1207_s11 = scalar_select %p1043_p5, 1, 0 }
   0xd   : > { %s1208_s12 = scalar_select %p1047_p6, 1, 0 }
   0xe   : > { %p1204_p9 = scmp.eq.s32.totalorder %s1026_s28, 0  ;;  %p1054_p10 = pnand %p722_p7, %p210_p8 }
   0xf   : > { %s952_s14 = smov [#allocation2]   ;;  %s856_s19 = scalar_lea.hbm %s1197_s1, 64 }
  0x10   : > { %s1209_s13 = scalar_select %p1054_p10, 1, 0 }
  0x11   : > { %s223_s15 = sshll.u32 %s952_s14, 4  ;;  %p763_p11 = pneg %p1054_p10  ;;  %s224_s15 = int_to_ptr.vmem [resolvable:$true] %s223_s15 }
  0x12   : > { %p857_p13 = scmp.ne.s32.totalorder %s1197_s1, %s856_s19  ;;  %p863_p3 = scmp.lt.u32.totalorder %s856_s19, %s1197_s1 }
  0x13   : > { %p1062_p12 = pnand %p1204_p9, %p763_p11 }
  0x15   : > { %p858_p0 = pneg %p1062_p12 }
  0x17   : > { %p859_p1 = pnand %p858_p0, %p857_p13 }
  0x19   : > { %p860_p2 = pneg %p859_p1 }
  0x1b   : > { %p865_p4 = pnand %p863_p3, %p860_p2 }
  0x1d   : > { %868 = shalt.err (!%p865_p4)
}
  0x1e   : > { %s869_s29 = scalar_lea.vmem %s224_s15, 64  ;;  %p877_p9 = scmp.lt.s32.totalorder %s224_s15, %s224_s15 }
  0x1f   : > { %p870_p7 = scmp.ne.s32.totalorder %s224_s15, %s869_s29  ;;  %p878_p6 = scmp.lt.s32.totalorder %s869_s29, %s869_s29 }
  0x21   : > { %p872_p8 = pnand %p870_p7, %p858_p0  ;;  %p879_p5 = por %p878_p6, %p877_p9 }
  0x23   : > { %p873_p11 = pneg %p872_p8 }
  0x25   : > { %p880_p10 = pnand %p879_p5, %p873_p11 }
  0x27   : > { %883 = shalt.err (!%p880_p10)
}
  0x28   : > { %766 = dma.hbm_to_vmem [thread:$0]  (!%p1062_p12), %s1197_s1, 64, %s224_s15, [#allocation3]  }
  0x29   : > { %p1211_p13 = scmp.ne.s32.totalorder %s1209_s13, 0 }
  0x2a   : > { %p1212_p1 = scmp.eq.s32.totalorder (!%p1211_p13), %s1026_s28, 0 }
  0x2b   : > { %256 = sbr.rel (%p1211_p13) target bundleno = 783 (0x30f), region = 44 }
  0x32   : > { %929 = dma.done.wait (%p1212_p1), [#allocation3], 64   ;;  %p1213_p0 = pmov %p1212_p1 }
  0x33   : > { %p292_p6 = scmp.lt.s32.totalorder %s1026_s28, 1  ;;  %v306_v0 = vlaneseq  ;;  %v302_v5 = vld [vmem:[#allocation2] ss:$2 sm:$0x3]  ;;  %s953_s18 = smov 16   ;;  %v960_v24 = vmov 0.0  }
  0x34   : > { %931 = vsyncadd (%p1213_p0), [#allocation3], 4294967232  ;;  %v304_v9 = vld [vmem:[#allocation2 + $0x1] ss:$2 sm:$0x3]  ;;  %s954_s19 = smov 17   ;;  %512 = vmatprep.mubr.f32.mxu0 %v960_v24  ;;  %744 = vmatprep.subr.mxu1 %v960_v24 }
  0x35   : > { %s1090_s14 = scalar_select %p292_p6, %s1026_s28, 1  ;;  %v307_v1 = vshrl.u32 %v306_v0, 7  ;;  %v961_v25 = vmov 0   ;;  %v433_v26 = vld [vmem:[%s1199_s3] sm:$0xff]  ;;  %vm346_vm0 = vcmask 130048   ;;  %vm335_vm1 = vcmask 138240  }
  0x36   : > { %s955_s20 = smov 1   ;;  %s956_s21 = smov 15   ;;  %853 = vset.pattern.permute.xlu1 %v961_v25  ;;  %854 = vset.pattern.permute.xlu0 %v961_v25  ;;  %vm365_vm2 = vcmask 7168   ;;  %vm356_vm3 = vcmask 121856   ;;  %vm373_vm4 = vcmask 1039360   ;;  %vm423_vm5 = vcmask 1043456  }
  0x37   : > { %s740_s16 = sshll.u32 %s1090_s14, 3  ;;  %v308_v2 = vsub.s32 0, %v307_v1  ;;  %v312_v3 = vsub.s32 1, %v307_v1  ;;  %s957_s22 = smov 127   ;;  %vm390_vm6 = vcmask 916480   ;;  %vm381_vm7 = vcmask 924672  }
  0x38   : > { %s296_s17 = scalar_lea.vmem %s1196_s0, %s740_s16  ;;  %s958_s23 = smov 112   ;;  %vm398_vm8 = vcmask 908288   ;;  %vm439_vm9 = vcmask 293888   ;;  %vm963_vm10 = vmmov 0   ;;  %vm529_vm11 = vcmask 64512  }
  0x39   : > { %v1098_v4 = vld [vmem:[%s296_s17] sm:$0xff]  ;;  %v309_v7 = vrot.slane %v302_v5, %v308_v2  ;;  %v313_v8 = vrot.slane %v302_v5, %v312_v3  ;;  %v321_v10 = vrot.slane %v304_v9, %v308_v2  ;;  %v325_v11 = vrot.slane %v304_v9, %v312_v3  ;;  %s959_s29 = smov 113   ;;  %s962_s8 = smov 111   ;;  %746 = vmatprep.mubr.msk.f32.mxu1 %vm963_vm10, %v960_v24 }
  0x3a   : > { %v1102_v6 = vcombine.high %v1098_v4, %v1098_v4  ;;  %p1214_p9 = scmp.ne.s32.totalorder %s1207_s11, 0 }
  0x3b   : > { %v314_v13 = vcombine.low %v309_v7, %v313_v8  ;;  %v326_v14 = vcombine.low %v321_v10, %v325_v11 }
  0x3c   : > { %v818_v12 = vpack.i.bf16 %v1102_v6, %v1098_v4  ;;  %v838_v22 = vpack.i.bf16 %v1098_v4, %v1102_v6 }
  0x3d   : > { %v316_v15 = vmul.f32 %v314_v13, %v1098_v4  ;;  %v328_v16 = vmul.f32 %v326_v14, %v1098_v4 }
  0x3e   : > { %819 = vrot.lane.b32.xlu0 %v818_v12, %s953_s18  ;;  %s283_s18 = sand.u32 1, %s942_s25  }
  0x3f   : > { %v330_v17 = vcombine.high %v316_v15, %v316_v15  ;;  %v351_v18 = vcombine.high %v328_v16, %v328_v16  ;;  %s605_s15 = scalar_lea.sflag [#allocation4], %s283_s18 }
  0x41   : > { %v828_v19 = vpack.i.bf16 %v330_v17, %v316_v15  ;;  %v833_v20 = vpack.i.bf16 %v351_v18, %v328_v16  ;;  %v843_v21 = vpack.i.bf16 %v328_v16, %v351_v18  ;;  %v848_v23 = vpack.i.bf16 %v316_v15, %v330_v17 }
  0x43   : > { %829 = vrot.lane.b32.xlu1 %v828_v19, %s954_s19  ;;  %824 = vrot.lane.b32.xlu0 %v828_v19, %s955_s20  ;;  %s727_s19 = sshll.u32 %s283_s18, 4 }
  0x44   : > { %s285_s20 = scalar_lea.vmem [#allocation5], %s727_s19  ;;  %s964_s19 = smov [#allocation5]  }
  0x47   : > { %834 = vrot.lane.b32.xlu1 %v833_v20, %s956_s21  ;;  %844 = vrot.lane.b32.xlu0 %v843_v21, %s957_s22  ;;  %s888_s21 = sshll.u32 %s964_s19, 4  ;;  %s889_s21 = int_to_ptr.vmem [resolvable:$false] %s888_s21 }
  0x48   : > { %s890_s22 = scalar_lea.vmem %s889_s21, 512 }
  0x4b   : > { %839 = vrot.lane.b32.xlu1 %v838_v22, %s958_s23  ;;  %849 = vrot.lane.b32.xlu0 %v848_v23, %s959_s29  ;;  %s741_s23 = sshll.u32 %s1026_s28, 8  ;;  %s623_s29 = sshll.u32 %s285_s20, 4  ;;  %s624_s29 = int_to_ptr.vmem [resolvable:$true] %s623_s29 }
  0x4c   : > { %s1151_s13 = scalar_lea.hbm %s1202_s6, %s741_s23  ;;  %s884_s17 = scalar_lea.vmem %s624_s29, 256 }
  0x4d   : > { %p885_p5 = scmp.ne.s32.totalorder %s624_s29, %s884_s17  ;;  %p891_p2 = scmp.lt.s32.totalorder %s624_s29, %s889_s21 }
  0x4e   : > { %p892_p3 = scmp.lt.s32.totalorder %s890_s22, %s884_s17 }
  0x4f   : > { %396 = vrot.lane.b32.xlu1 %v351_v18, %s962_s8  ;;  %394 = vrot.lane.b32.xlu0 %v328_v16, %s962_s8  ;;  %p886_p10 = pnand %p885_p5, %p1214_p9 }
  0x50   : > { %p893_p4 = por %p892_p3, %p891_p2 }
  0x51   : > { %p887_p12 = pneg %p886_p10 }
  0x53   : > { %436 = vperm.xlu1 %853, %v433_v26   ;;  %p894_p7 = pnand %p893_p4, %p887_p12 }
  0xb0   : > { %v820_v27 = vpop.permute.xlu0 %819 }
  0xb1   : > { %v822_v28 = vunpack.i.h.bf16 %v820_v27  ;;  %v821_v29 = vunpack.i.l.bf16 %v820_v27 }
  0xb3   : > { %v349_v30 = vsel %vm346_vm0, 0.0, %v821_v29  ;;  %v347_v33 = vsel %vm346_vm0, %v821_v29, %v822_v28 }
  0xb4   : > { %v403_v38 = vrot.slane %v349_v30, 4  ;;  %v404_v41 = vrot.slane %v347_v33, 4 }
  0xb5   : > { %v830_v31 = vpop.permute.xlu1 %829  ;;  %v825_v32 = vpop.permute.xlu0 %824 }
  0xb6   : > { %v832_v34 = vunpack.i.h.bf16 %v830_v31  ;;  %v831_v35 = vunpack.i.l.bf16 %v830_v31  ;;  %v827_v36 = vunpack.i.h.bf16 %v825_v32  ;;  %v826_v37 = vunpack.i.l.bf16 %v825_v32 }
  0xb8   : > { %v368_v39 = vsel %vm365_vm2, 0.0, %v826_v37  ;;  %v366_v40 = vsel %vm365_vm2, %v826_v37, %v827_v36  ;;  %v339_v42 = vsel %vm335_vm1, 0.0, %v831_v35  ;;  %v336_v46 = vsel %vm335_vm1, %v831_v35, %v832_v34  ;;  %v527_v34 = vld [vmem:[%s1200_s4] sm:$0xff] }
  0xb9   : > { %v408_v43 = vrot.slane %v368_v39, 4  ;;  %v835_v44 = vpop.permute.xlu1 %834  ;;  %v845_v45 = vpop.permute.xlu0 %844  ;;  %v409_v47 = vrot.slane %v366_v40, 4  ;;  %v425_v58 = vsel %vm423_vm5, %v336_v46, %v404_v41  ;;  %v424_v60 = vsel %vm423_vm5, %v339_v42, %v403_v38 }
  0xba   : > { %v837_v48 = vunpack.i.h.bf16 %v835_v44  ;;  %v836_v49 = vunpack.i.l.bf16 %v835_v44  ;;  %v847_v50 = vunpack.i.h.bf16 %v845_v45  ;;  %v846_v51 = vunpack.i.l.bf16 %v845_v45 }
  0xbc   : > { %v360_v52 = vsel %vm356_vm3, 0.0, %v836_v49  ;;  %v374_v53 = vsel %vm373_vm4, %v847_v50, %v846_v51  ;;  %v376_v54 = vsel %vm373_vm4, %v846_v51, 0.0  ;;  %v357_v55 = vsel %vm356_vm3, %v836_v49, %v837_v48 }
  0xbd   : > { %v840_v56 = vpop.permute.xlu1 %839  ;;  %v850_v57 = vpop.permute.xlu0 %849  ;;  %v427_v59 = vsel %vm423_vm5, %v357_v55, %v409_v47  ;;  %v426_v61 = vsel %vm423_vm5, %v360_v52, %v408_v43  ;;  %v414_v2 = vrot.slane %v374_v53, 4  ;;  %v415_v3 = vrot.slane %v376_v54, 4 }
  0xbe   : > { %v842_v62 = vunpack.i.h.bf16 %v840_v56  ;;  %v841_v63 = vunpack.i.l.bf16 %v840_v56  ;;  %v852_v0 = vunpack.i.h.bf16 %v850_v57  ;;  %v851_v1 = vunpack.i.l.bf16 %v850_v57 }
  0xbf   : > { %v749_v5 = vpack.c.bf16 %v427_v59, %v425_v58  ;;  %v751_v7 = vpack.c.bf16 %v426_v61, %v424_v60  ;;  %v429_v15 = vsel %vm423_vm5, %v1102_v6, %v415_v3  ;;  %v428_v17 = vsel %vm423_vm5, %v1098_v4, %v414_v2  ;;  %v432_v6 = vld [vmem:[%s1198_s2] sm:$0xff] }
  0xc0   : > { %v391_v8 = vsel %vm390_vm6, %v842_v62, %v841_v63  ;;  %v393_v9 = vsel %vm390_vm6, %v841_v63, 0.0  ;;  %v382_v10 = vsel %vm381_vm7, %v852_v0, %v851_v1  ;;  %v385_v11 = vsel %vm381_vm7, %v851_v1, 0.0 }
  0xc1   : > { %v419_v12 = vrot.slane %v391_v8, 4  ;;  %v420_v13 = vrot.slane %v393_v9, 4  ;;  %750 = vmatprep.subr.bf16.mxu0 %v749_v5  ;;  %v397_v14 = vpop.permute.xlu1 %396  ;;  %v395_v22 = vpop.permute.xlu0 %394 }
  0xc2   : > { %752 = vmatpush1.bf16.msra.mxu0 %v751_v7  ;;  %v401_v21 = vsel %vm398_vm8, %v397_v14, 0.0  ;;  %v399_v23 = vsel %vm398_vm8, %v395_v22, %v397_v14 }
  0xc3   : > { %v431_v16 = vsel %vm423_vm5, %v385_v11, %v420_v13  ;;  %v430_v18 = vsel %vm423_vm5, %v382_v10, %v419_v12 }
  0xc4   : > { %v753_v19 = vpack.c.bf16 %v431_v16, %v429_v15  ;;  %v755_v20 = vpack.c.bf16 %v430_v18, %v428_v17 }
  0xc6   : > { %754 = vmatprep.subr.bf16.mxu0 %v753_v19 }
  0xc7   : > { %756 = vmatpush1.bf16.msra.mxu0 %v755_v20 }
  0xc8   : > { %731 = vmatprep.subr.msk.mxu0 %vm423_vm5, %v401_v21 }
  0xcb   : > { %732 = vmatpush1.msk.msra.mxu0 %vm423_vm5, %v399_v23 }
  0xcc   : > { %733 = vmatmul.mubr.msk.f32.vlgmr.msra.gmra.mrb[0].mxu0 %vm439_vm9, %v432_v6 }
  0xd2   : > { %v437_v4 = vpop.permute.xlu1 %436 }
 0x19f   : > { %v514_v25 = vpop.f32.mrb[0].mxu0 }
 0x1a0   : > { %v515_v26 = vadd.f32 %v514_v25, %v437_v4  ;;  %v516_v27 = vpop.f32.mrb[1].mxu0 }
 0x1a1   : > { %v517_v28 = vadd.f32 %v516_v27, %v437_v4 }
 0x1a2   : > { %v519_v29 = vmax.f32 %v515_v26, 0.0 }
 0x1a3   : > { %v520_v30 = vmax.f32 %v517_v28, 0.0 }
 0x1a4   : > { %521 = vst [vmem:[%s285_s20] sm:$0xff] %v519_v29 }
 0x1a5   : > { %522 = vst [vmem:[%s285_s20 + $0x8] sm:$0xff] %v520_v30  ;;  %v523_v31 = vadd.f32 %v520_v30, %v519_v29 }
 0x1a7   : > { %524 = vadd.xlane.f32.xlu0 %v523_v31 }
 0x234   : > { %v525_v32 = vpop.xlane.xlu0 %524 }
 0x235   : > { %v526_v33 = vmul.f32 0.00390625, %v525_v32 }
 0x237   : > { %745 = vmatpush3.msra.mxu1 %v526_v33 }
 0x238   : > { %747 = vmatmul.mubr.msk.f32.vlgmr.msra.gmra.mrb[0].mxu1 %vm529_vm11, %v527_v34 }
 0x239   : > { %897 = shalt.err (!%p894_p7)
}
 0x23a   : > { %s898_s28 = scalar_lea.hbm %s1151_s13, 256  ;;  %s902_s23 = scalar_lea.hbm %s1202_s6, 512 }
 0x23b   : > { %p899_p8 = scmp.ne.s32.totalorder %s1151_s13, %s898_s28  ;;  %p903_p1 = scmp.lt.u32.totalorder %s1151_s13, %s1202_s6 }
 0x23c   : > { %p904_p0 = scmp.lt.u32.totalorder %s902_s23, %s898_s28  ;;  %p906_p5 = scmp.lt.u32.totalorder %s898_s28, %s1151_s13 }
 0x23d   : > { %p900_p11 = pnand %p899_p8, %p1214_p9 }
 0x23e   : > { %p905_p6 = por %p904_p0, %p903_p1 }
 0x23f   : > { %p901_p13 = pneg %p900_p11 }
 0x240   : > { %p907_p10 = por %p906_p5, %p905_p6 }
 0x242   : > { %p908_p12 = pnand %p907_p10, %p901_p13 }
 0x244   : > { %911 = shalt.err (!%p908_p12)
}
 0x245   : > { %761 = dma.vmem_to_hbm [thread:$0]  (%p1214_p9), %s624_s29, 256, %s1151_s13, %s605_s15   ;;  %v528_v24 = vld [vmem:[%s1201_s5] sm:$0xff] }
 0x246   : > { %s300_s18 = scalar_lea.vmem %s1203_s7, %s740_s16 }
 0x30b   : > { %v599_v35 = vpop.f32.mrb[0].mxu1 }
 0x30c   : > { %v600_v36 = vadd.f32 %v599_v35, %v528_v24  ;;  %v748_v37 = vpop.f32.mrb[1].mxu1 }
 0x30e   : > { %603 = vst.msk [vmem:[%s300_s18] sm:$0xff] %vm365_vm2, %v600_v36 }
 0x30f PF: > { %p773_p2 = scmp.ge.s32.totalorder %s950_s27, 2  ;;  %s638_s11 = sand.u32 1, %s938_s24  }
 0x310   : > { %p1215_p9 = scmp.ne.s32.totalorder %s1208_s12, 0  ;;  %s639_s29 = scalar_lea.sflag [#allocation4], %s638_s11 }
 0x312   : > { %p768_p3 = pnand %p773_p2, %p1215_p9 }
 0x314   : > { %933 = dma.done.wait (!%p768_p3), %s639_s29, 256  }
 0x315   : > { %935 = vsyncadd (!%p768_p3), %s639_s29, 4294967040  ;;  %p19_p4 = scmp.ge.s32.totalorder %s1030_s30, 4   ;;  %s1216_s24 = smov %s942_s25 }
 0x316   : > { %s1217_s25 = smov %s946_s26  ;;  %s1218_s26 = smov %s1041_s10 }
 0x317   : > { %s1219_s27 = smov %s1030_s30  ;;  %21 = sbr.rel (!%p19_p4) target bundleno = 4 (0x4), region = 97 }
 0x31e   :  { %651 = vsyncpa [#allocation3], 1 }
 0x31f   :  { %653 = vsyncpa [#allocation3 + $0x1], 1 }
 0x320   :  { %654 = vsyncpa [#allocation4], 1 }
 0x321   :  { %656 = vsyncpa [#allocation4 + $0x1], 1 }

</bundles_post_ra>
